<compile_context>
chip_gen: v7x
topology: tpu7x:2x2x1
jax: 0.10.0
libtpu: 0.0.40
codegen_flags: <defaults>
</compile_context>

<pallas_src>
import functools

import jax
import jax.numpy as jnp
from jax.experimental import pallas as pl
from jax.experimental.pallas import tpu as pltpu

_LANE = 128
_NEG_INF = -1e30  # drives padded class logits out of the softmax normalizer


def classifier_head_kernel(x_ref, w1_ref, b1_ref, w2_ref, b2_ref, o_ref):
    # x:  (B, H)      f32 pooled CLS features (cast to bf16 in-kernel for the MXU)
    # w1: (H, 512)    bf16, pre-transposed to native [K, N] order (no in-kernel relayout)
    # b1: (1, 512)    f32
    # w2: (512, CP)   bf16, classes zero-padded to CP (lane-dense), pre-transposed [K, N]
    # b2: (1, CP)     f32, padded entries = -1e30
    # o:  (B, CP)     f32 log-softmax slab; padded lanes are huge-negative, never win argmax

    # fc1 + bias + ReLU  (bf16 MXU inputs, f32 accumulate, f32 elementwise)
    x = x_ref[...].astype(jnp.bfloat16)
    h = jnp.dot(x, w1_ref[...], preferred_element_type=jnp.float32)
    h = jnp.maximum(h + b1_ref[...], 0.0)

    # dropout: identity at inference time (PyTorch nn.Dropout in eval mode)
    # TODO(synk): training-mode dropout would need pltpu.prng_seed + stateful_bernoulli masking.

    # fc2 + bias  (lane-dense CP-wide output)
    logits = jnp.dot(h.astype(jnp.bfloat16), w2_ref[...],
                     preferred_element_type=jnp.float32) + b2_ref[...]

    # LogSoftmax along dim=1 (numerically stable). Padded lanes sit at ~-1e30 so
    # exp(logit - m) underflows to exactly 0 and they do not perturb the normalizer.
    m = jnp.max(logits, axis=1, keepdims=True)
    lse = m + jnp.log(jnp.sum(jnp.exp(logits - m), axis=1, keepdims=True))
    o_ref[...] = logits - lse


def prepare_classifier_params(w1, b1, w2, b2):
    """One-time parameter prep (NOT part of the per-call path).

    Pre-transposes PyTorch Linear (out, in) weights into MXU-native [K, N] layout,
    casts matmul operands to bf16, and pads the class dimension to a multiple of
    128 lanes (padded w2 columns are exactly zero; padded b2 lanes are -1e30).
    """
    F1, H = w1.shape           # (512, hidden)
    C = w2.shape[0]            # n_classes
    CP = max(_LANE, ((C + _LANE - 1) // _LANE) * _LANE)

    w1_p = jnp.asarray(w1, jnp.bfloat16).T                               # (H, 512)
    b1_p = jnp.asarray(b1, jnp.float32)[None, :]                         # (1, 512)
    w2_p = (jnp.zeros((F1, CP), jnp.bfloat16)
            .at[:, :C].set(jnp.asarray(w2, jnp.bfloat16).T))             # (512, CP)
    b2_p = (jnp.full((1, CP), _NEG_INF, jnp.float32)
            .at[0, :C].set(jnp.asarray(b2, jnp.float32)))                # (1, CP)
    return w1_p, b1_p, w2_p, b2_p, C


def classifier_head_padded(cls_output, w1_p, b1_p, w2_p, b2_p):
    """Returns the padded (B, CP) log-softmax slab -- no extra wrapper ops.

    Padded class lanes are ~-1e30, so argmax / gather on real labels is unaffected;
    consumers that need exactly (B, C) should slice inside their own jit (see
    classifier_head_logprobs) so the slice fuses with the surrounding graph.
    """
    B, H = cls_output.shape
    F1 = w1_p.shape[1]
    CP = w2_p.shape[1]

    flops = 2 * B * (H * F1 + F1 * CP)
    transcendentals = 2 * B * CP  # exp + log in the log-sum-exp
    bytes_accessed = (cls_output.size * 4 + w1_p.size * 2 + b1_p.size * 4
                      + w2_p.size * 2 + b2_p.size * 4 + B * CP * 4)

    vmem = pl.BlockSpec(memory_space=pltpu.MemorySpace.VMEM)
    # Everything fits comfortably in VMEM at these shapes (~140 KB total): gridless,
    # single block, one kernel invocation. See scale-up TODO at top of file.
    return pl.pallas_call(
        classifier_head_kernel,
        out_shape=jax.ShapeDtypeStruct((B, CP), jnp.float32),
        in_specs=[vmem, vmem, vmem, vmem, vmem],
        out_specs=vmem,
        cost_estimate=pl.CostEstimate(
            flops=flops,
            transcendentals=transcendentals,
            bytes_accessed=bytes_accessed,
        ),
    )(cls_output, w1_p, b1_p, w2_p, b2_p)


@functools.partial(jax.jit, static_argnames=("n_classes",))
def classifier_head_logprobs(cls_output, w1_p, b1_p, w2_p, b2_p, n_classes):
    """Convenience consumer: (B, n_classes) log-probs with the slice fused under jit."""
    slab = classifier_head_padded(cls_output, w1_p, b1_p, w2_p, b2_p)
    return slab[:, :n_classes]


if __name__ == "__main__":
    # Small shapes consistent with the module's forward:
    # batch=8, hidden_size=128, fc1 width=512, n_classes=2.
    B, H, F1, C = 8, 128, 512, 2

    key = jax.random.PRNGKey(0)
    k_x, k_w1, k_b1, k_w2, k_b2 = jax.random.split(key, 5)

    # Stand-in for transformer pooled output (see TODO above).
    cls_output = jax.random.normal(k_x, (B, H), dtype=jnp.float32)

    # Deterministic parameter init (PyTorch Linear shapes: (out, in)).
    w1 = jax.random.normal(k_w1, (F1, H), dtype=jnp.float32) * (1.0 / jnp.sqrt(H))
    b1 = jax.random.normal(k_b1, (F1,), dtype=jnp.float32) * 0.02
    w2 = jax.random.normal(k_w2, (C, F1), dtype=jnp.float32) * (1.0 / jnp.sqrt(F1))
    b2 = jax.random.normal(k_b2, (C,), dtype=jnp.float32) * 0.02

    w1_p, b1_p, w2_p, b2_p, n_classes = prepare_classifier_params(w1, b1, w2, b2)

    # Raw padded slab (hot path: just the pallas_call, no extra XLA ops).
    slab = jax.block_until_ready(
        classifier_head_padded(cls_output, w1_p, b1_p, w2_p, b2_p))
    # Fused consumer path: slice lives inside the same jit as the call.
    out = jax.block_until_ready(
        classifier_head_logprobs(cls_output, w1_p, b1_p, w2_p, b2_p, n_classes))

    # Pure-JAX f32 reference of the PyTorch forward (fc1 -> ReLU -> fc2 -> LogSoftmax).
    h_ref = jnp.maximum(cls_output @ w1.T + b1, 0.0)
    ref = jax.nn.log_softmax(h_ref @ w2.T + b2, axis=1)

    assert slab.shape == (B, w2_p.shape[1])
    assert out.shape == (B, C)
    row_sums = jnp.sum(jnp.exp(out), axis=1)
    assert bool(jnp.allclose(row_sums, 1.0, atol=1e-5))            # valid log-probabilities
    assert bool(jnp.allclose(out, ref, atol=1e-1))                 # matches f32 reference (bf16 tol)
    assert bool(jnp.all(jnp.argmax(slab, axis=1) == jnp.argmax(ref, axis=1)))  # padded lanes never win
    assert bool(jnp.all(slab[:, C:] < -1e20))                      # padded lanes stay huge-negative

    print("KERNEL_OK")
</pallas_src>

<mosaic_0001>
module attributes {stable_mosaic.version = 11 : i64} {
  func.func @classifier_head_kernel(%arg0: memref<8x128xf32, #tpu.memory_space<vmem>>, %arg1: memref<128x512xbf16, #tpu.memory_space<vmem>>, %arg2: memref<1x512xf32, #tpu.memory_space<vmem>>, %arg3: memref<512x128xbf16, #tpu.memory_space<vmem>>, %arg4: memref<1x128xf32, #tpu.memory_space<vmem>>, %arg5: memref<8x128xf32, #tpu.memory_space<vmem>>) attributes {dimension_semantics = [], scalar_prefetch = 0 : i64, scratch_operands = 0 : i64, tpu.core_type = #tpu.core_type<tc>} {
    %c0 = arith.constant 0 : index
    %c0_0 = arith.constant 0 : index
    %0 = vector.load %arg0[%c0, %c0_0] : memref<8x128xf32, #tpu.memory_space<vmem>>, vector<8x128xf32>
    %1 = arith.truncf %0 : vector<8x128xf32> to vector<8x128xbf16>
    %c0_1 = arith.constant 0 : index
    %c0_2 = arith.constant 0 : index
    %2 = vector.load %arg1[%c0_1, %c0_2] : memref<128x512xbf16, #tpu.memory_space<vmem>>, vector<128x512xbf16>
    %cst = arith.constant dense<0.000000e+00> : vector<8x512xf32>
    %3 = tpu.matmul %1, %2, %cst {dimension_numbers = #tpu.dot_dimension_numbers<[1], [0], [0], [1], [0, 0, 1, 1], [], []>} : vector<8x128xbf16>, vector<128x512xbf16>, vector<8x512xf32> -> vector<8x512xf32>
    %c0_3 = arith.constant 0 : index
    %c0_4 = arith.constant 0 : index
    %4 = vector.load %arg2[%c0_3, %c0_4] : memref<1x512xf32, #tpu.memory_space<vmem>>, vector<1x512xf32>
    %5 = vector.broadcast %4 : vector<1x512xf32> to vector<8x512xf32>
    %6 = arith.addf %3, %5 : vector<8x512xf32>
    %cst_5 = arith.constant 0.000000e+00 : f32
    %7 = vector.broadcast %cst_5 : f32 to vector<8x512xf32>
    %8 = arith.maximumf %6, %7 : vector<8x512xf32>
    %9 = arith.truncf %8 : vector<8x512xf32> to vector<8x512xbf16>
    %c0_6 = arith.constant 0 : index
    %c0_7 = arith.constant 0 : index
    %10 = vector.load %arg3[%c0_6, %c0_7] : memref<512x128xbf16, #tpu.memory_space<vmem>>, vector<512x128xbf16>
    %cst_8 = arith.constant dense<0.000000e+00> : vector<8x128xf32>
    %11 = tpu.matmul %9, %10, %cst_8 {dimension_numbers = #tpu.dot_dimension_numbers<[1], [0], [0], [1], [0, 0, 1, 1], [], []>} : vector<8x512xbf16>, vector<512x128xbf16>, vector<8x128xf32> -> vector<8x128xf32>
    %c0_9 = arith.constant 0 : index
    %c0_10 = arith.constant 0 : index
    %12 = vector.load %arg4[%c0_9, %c0_10] : memref<1x128xf32, #tpu.memory_space<vmem>>, vector<1x128xf32>
    %13 = vector.broadcast %12 : vector<1x128xf32> to vector<8x128xf32>
    %14 = arith.addf %11, %13 : vector<8x128xf32>
    %cst_11 = arith.constant dense<0xFF800000> : vector<8xf32>
    %15 = vector.multi_reduction <maximumf>, %14, %cst_11 [1] : vector<8x128xf32> to vector<8xf32>
    %16 = vector.shape_cast %15 : vector<8xf32> to vector<8x1xf32>
    %17 = vector.broadcast %16 : vector<8x1xf32> to vector<8x128xf32>
    %18 = arith.subf %14, %17 : vector<8x128xf32>
    %19 = math.exp %18 : vector<8x128xf32>
    %cst_12 = arith.constant dense<0.000000e+00> : vector<8xf32>
    %20 = vector.multi_reduction <add>, %19, %cst_12 [1] : vector<8x128xf32> to vector<8xf32>
    %21 = vector.shape_cast %20 : vector<8xf32> to vector<8x1xf32>
    %22 = math.log %21 : vector<8x1xf32>
    %23 = arith.addf %16, %22 : vector<8x1xf32>
    %24 = vector.broadcast %23 : vector<8x1xf32> to vector<8x128xf32>
    %25 = arith.subf %14, %24 : vector<8x128xf32>
    %c0_13 = arith.constant 0 : index
    %c0_14 = arith.constant 0 : index
    %26 = vector.load %arg5[%c0_13, %c0_14] : memref<8x128xf32, #tpu.memory_space<vmem>>, vector<8x128xf32>
    tpu.vector_store %arg5[%c0_13, %c0_14], %25 {strides = array<i32>} : memref<8x128xf32, #tpu.memory_space<vmem>>, vector<8x128xf32>,
    return
  }
}

</mosaic_0001>

<bundles_post_ra>
// kernel: tpu_custom_call.1
= control target key start
LH: loop header
LB: loop body
LE: loop exit
PB: predicated region body
PF: predicated region fallthrough
CT: control target
= control target key end

     0   :  { %10 = vsyncpa [#allocation3], 0  ;;  %s1127_s0 = inlined_call_operand.hbm [shape: f32[8,128], index: 0, kind: input, shape index: {}]   ;;  %s1128_s1 = inlined_call_operand.hbm [shape: bf16[128,512], index: 1, kind: input, shape index: {}]   ;;  %s1129_s2 = inlined_call_operand.vmem [shape: f32[1,512], index: 2, kind: input, shape index: {}]   ;;  %s1130_s3 = inlined_call_operand.hbm [shape: bf16[512,128], index: 3, kind: input, shape index: {}]   ;;  %s1131_s4 = inlined_call_operand.vmem [shape: f32[1,128], index: 4, kind: input, shape index: {}]   ;;  %s1132_s5 = inlined_call_operand.hbm [shape: f32[8,128], index: 5, kind: output, shape index: {}]  }
   0x1   :  { %11 = vsyncpa [#allocation6], 0 }
   0x2   :  { %12 = vsyncpa [#allocation4], 0  ;;  %s1034_s18 = smov [#allocation5]   ;;  %s940_s22 = scalar_lea.hbm %s1128_s1, 4096 }
   0x3   :  { %s28_s19 = sshll.u32 %s1034_s18, 4  ;;  %p941_p0 = scmp.ne.s32.totalorder %s1128_s1, %s940_s22  ;;  %s29_s19 = int_to_ptr.vmem [resolvable:$true] %s28_s19 }
   0x4   :  { %p944_p1 = scmp.lt.u32.totalorder %s940_s22, %s1128_s1 }
   0x6   :  { %p946_p2 = pnand %p944_p1, %p941_p0 }
   0x8   :  { %949 = shalt.err (!%p946_p2)
}
   0x9   :  { %s950_s27 = scalar_lea.vmem %s29_s19, 4096  ;;  %p955_p4 = scmp.lt.s32.totalorder %s29_s19, %s29_s19 }
   0xa   :  { %p951_p3 = scmp.ne.s32.totalorder %s29_s19, %s950_s27  ;;  %p956_p5 = scmp.lt.s32.totalorder %s950_s27, %s950_s27 }
   0xc   :  { %p957_p6 = por %p956_p5, %p955_p4 }
   0xe   :  { %p958_p7 = pnand %p957_p6, %p951_p3 }
  0x10   :  { %961 = shalt.err (!%p958_p7)
}
  0x11   :  { %s1035_s28 = smov 256   ;;  %s1036_s29 = smov 16  }
  0x12   :  { %34 = dma.hbm_to_vmem [thread:$0]  %s1128_s1, 4096, %s29_s19, [#allocation6], %s1035_s28, %s1035_s28, %s1036_s29  }
  0x13   :  { %s1037_s7 = smov [#allocation2]   ;;  %s1038_s9 = smov [#allocation7]  }
  0x14   :  { %s19_s8 = sshll.u32 %s1037_s7, 4  ;;  %s42_s10 = sshll.u32 %s1038_s9, 4  ;;  %s20_s8 = int_to_ptr.vmem [resolvable:$true] %s19_s8  ;;  %s43_s10 = int_to_ptr.vmem [resolvable:$true] %s42_s10 }
  0x15   :  { %s962_s13 = scalar_lea.hbm %s1127_s0, 128 }
  0x16   :  { %p963_p8 = scmp.ne.s32.totalorder %s1127_s0, %s962_s13  ;;  %p966_p9 = scmp.lt.u32.totalorder %s962_s13, %s1127_s0 }
  0x18   :  { %p968_p10 = pnand %p966_p9, %p963_p8 }
  0x1a   :  { %971 = shalt.err (!%p968_p10)
}
  0x1b   :  { %s972_s1 = scalar_lea.vmem %s20_s8, 128  ;;  %p977_p12 = scmp.lt.s32.totalorder %s20_s8, %s20_s8 }
  0x1c   :  { %p973_p11 = scmp.ne.s32.totalorder %s20_s8, %s972_s1  ;;  %p978_p13 = scmp.lt.s32.totalorder %s972_s1, %s972_s1 }
  0x1e   :  { %p979_p0 = por %p978_p13, %p977_p12 }
  0x20   :  { %p980_p1 = pnand %p979_p0, %p973_p11 }
  0x22   :  { %983 = shalt.err (!%p980_p1)
}
  0x23   :  { %22 = dma.hbm_to_vmem [thread:$0]  %s1127_s0, 128, %s20_s8, [#allocation3]  }
  0x24   :  { %s984_s22 = scalar_lea.hbm %s1130_s3, 4096 }
  0x25   :  { %p985_p2 = scmp.ne.s32.totalorder %s1130_s3, %s984_s22  ;;  %p988_p3 = scmp.lt.u32.totalorder %s984_s22, %s1130_s3 }
  0x27   :  { %p990_p4 = pnand %p988_p3, %p985_p2 }
  0x29   :  { %993 = shalt.err (!%p990_p4)
}
  0x2a   :  { %s994_s27 = scalar_lea.vmem %s43_s10, 4096  ;;  %p999_p6 = scmp.lt.s32.totalorder %s43_s10, %s43_s10 }
  0x2b   :  { %p995_p5 = scmp.ne.s32.totalorder %s43_s10, %s994_s27  ;;  %p1000_p7 = scmp.lt.s32.totalorder %s994_s27, %s994_s27 }
  0x2d   :  { %p1001_p8 = por %p1000_p7, %p999_p6 }
  0x2f   :  { %p1002_p9 = pnand %p1001_p8, %p995_p5 }
  0x31   :  { %1005 = shalt.err (!%p1002_p9)
}
  0x32   :  { %s1039_s0 = smov 64   ;;  %s1040_s28 = smov 4  }
  0x33   :  { %48 = dma.hbm_to_vmem [thread:$0]  %s1130_s3, 4096, %s43_s10, [#allocation6], %s1039_s0, %s1039_s0, %s1040_s28  }
  0x34   :  { %1028 = dma.done.wait [#allocation3], 128  }
  0x35   :  { %1029 = vsyncadd [#allocation3], 4294967168 }
  0x36   :  { %1030 = dma.done.wait [#allocation6], 8192  }
  0x37   :  { %1031 = vsyncadd [#allocation6], 4294959104  ;;  %v1041_v0 = vmov 0   ;;  %v856_v1 = vld [vmem:[#allocation5 + $0x4] ss:$16 sps:$4 sm:$0xff]   ;;  %v61_v33 = vld [vmem:[#allocation2] sm:$0xff] }
  0x38   :  { %309 = vmatprep.mubr.bf16.mxu0 %v1041_v0  ;;  %350 = vmatprep.mubr.bf16.mxu1 %v1041_v0  ;;  %v858_v2 = vld [vmem:[#allocation5 + $0xc] ss:$16 sps:$4 sm:$0xff]   ;;  %v860_v3 = vld [vmem:[#allocation5] ss:$16 sps:$4 sm:$0xff]   ;;  %v861_v4 = vld [vmem:[#allocation5 + $0x8] ss:$16 sps:$4 sm:$0xff]   ;;  %v62_v37 = vpack.c.bf16 %v61_v33, %v61_v33 }
  0x39   :  { %277 = vmatprep.subr.bf16.mxu0 %v856_v1  ;;  %318 = vmatprep.subr.bf16.mxu1 %v858_v2  ;;  %v862_v5 = vld [vmem:[#allocation5 + $0x24] ss:$16 sps:$4 sm:$0xff]   ;;  %v864_v6 = vld [vmem:[#allocation5 + $0x2c] ss:$16 sps:$4 sm:$0xff]   ;;  %v866_v7 = vld [vmem:[#allocation5 + $0x20] ss:$16 sps:$4 sm:$0xff]  }
  0x3a   :  { %278 = vmatpush1.bf16.msra.mxu0 %v860_v3  ;;  %319 = vmatpush1.bf16.msra.mxu1 %v861_v4  ;;  %v867_v8 = vld [vmem:[#allocation5 + $0x28] ss:$16 sps:$4 sm:$0xff]   ;;  %v868_v9 = vld [vmem:[#allocation5 + $0x44] ss:$16 sps:$4 sm:$0xff]   ;;  %v870_v10 = vld [vmem:[#allocation5 + $0x4c] ss:$16 sps:$4 sm:$0xff]   ;;  %v97_v3 = vlaneseq }
  0x3b   :  { %279 = vmatprep.subr.bf16.mxu0 %v862_v5  ;;  %320 = vmatprep.subr.bf16.mxu1 %v864_v6  ;;  %v872_v11 = vld [vmem:[#allocation5 + $0x40] ss:$16 sps:$4 sm:$0xff]   ;;  %v873_v12 = vld [vmem:[#allocation5 + $0x48] ss:$16 sps:$4 sm:$0xff]   ;;  %v874_v13 = vld [vmem:[#allocation5 + $0x64] ss:$16 sps:$4 sm:$0xff]  }
  0x3c   :  { %v876_v14 = vld [vmem:[#allocation5 + $0x6c] ss:$16 sps:$4 sm:$0xff]   ;;  %v878_v15 = vld [vmem:[#allocation5 + $0x60] ss:$16 sps:$4 sm:$0xff]   ;;  %v879_v16 = vld [vmem:[#allocation5 + $0x68] ss:$16 sps:$4 sm:$0xff]  }
  0x3d   :  { %v880_v17 = vld [vmem:[#allocation5 + $0x84] ss:$16 sps:$4 sm:$0xff]   ;;  %v882_v18 = vld [vmem:[#allocation5 + $0x8c] ss:$16 sps:$4 sm:$0xff]   ;;  %v884_v19 = vld [vmem:[#allocation5 + $0x80] ss:$16 sps:$4 sm:$0xff]  }
  0x3e   :  { %280 = vmatpush1.bf16.msra.mxu0 %v866_v7  ;;  %321 = vmatpush1.bf16.msra.mxu1 %v867_v8  ;;  %v885_v20 = vld [vmem:[#allocation5 + $0x88] ss:$16 sps:$4 sm:$0xff]   ;;  %v886_v21 = vld [vmem:[#allocation5 + $0xa4] ss:$16 sps:$4 sm:$0xff]   ;;  %v888_v22 = vld [vmem:[#allocation5 + $0xac] ss:$16 sps:$4 sm:$0xff]  }
  0x3f   :  { %281 = vmatprep.subr.bf16.mxu0 %v868_v9  ;;  %322 = vmatprep.subr.bf16.mxu1 %v870_v10  ;;  %v890_v23 = vld [vmem:[#allocation5 + $0xa0] ss:$16 sps:$4 sm:$0xff]   ;;  %v891_v24 = vld [vmem:[#allocation5 + $0xa8] ss:$16 sps:$4 sm:$0xff]   ;;  %v892_v25 = vld [vmem:[#allocation5 + $0xc4] ss:$16 sps:$4 sm:$0xff]  }
  0x40   :  { %v894_v26 = vld [vmem:[#allocation5 + $0xcc] ss:$16 sps:$4 sm:$0xff]   ;;  %v896_v27 = vld [vmem:[#allocation5 + $0xc0] ss:$16 sps:$4 sm:$0xff]   ;;  %v897_v28 = vld [vmem:[#allocation5 + $0xc8] ss:$16 sps:$4 sm:$0xff]  }
  0x41   :  { %v898_v29 = vld [vmem:[#allocation5 + $0xe4] ss:$16 sps:$4 sm:$0xff]   ;;  %v900_v30 = vld [vmem:[#allocation5 + $0xec] ss:$16 sps:$4 sm:$0xff]   ;;  %v902_v31 = vld [vmem:[#allocation5 + $0xe0] ss:$16 sps:$4 sm:$0xff]  }
  0x42   :  { %282 = vmatpush1.bf16.msra.mxu0 %v872_v11  ;;  %323 = vmatpush1.bf16.msra.mxu1 %v873_v12  ;;  %v903_v32 = vld [vmem:[#allocation5 + $0xe8] ss:$16 sps:$4 sm:$0xff]   ;;  %v904_v34 = vld [vmem:[#allocation7 + $0x40] sm:$0xff]   ;;  %v912_v43 = vld [vmem:[#allocation7 + $0x50] sm:$0xff]   ;;  %v98_v4 = vshrl.u32 %v97_v3, 7 }
  0x43   :  { %283 = vmatprep.subr.bf16.mxu0 %v874_v13  ;;  %324 = vmatprep.subr.bf16.mxu1 %v876_v14  ;;  %v905_v35 = vld [vmem:[#allocation7 + $0xc0] sm:$0xff]   ;;  %v908_v39 = vld [vmem:[#allocation7 + $0x48] sm:$0xff]   ;;  %v913_v44 = vld [vmem:[#allocation7 + $0xd0] sm:$0xff]  }
  0x44   :  { %v906_v36 = vld [vmem:[#allocation7] sm:$0xff]   ;;  %v909_v40 = vld [vmem:[#allocation7 + $0xc8] sm:$0xff]   ;;  %v914_v45 = vld [vmem:[#allocation7 + $0x10] sm:$0xff]   ;;  %v99_v5 = vsub.s32 0, %v98_v4  ;;  %v107_v6 = vsub.s32 2, %v98_v4  ;;  %v103_v8 = vsub.s32 1, %v98_v4 }
  0x45   :  { %v907_v38 = vld [vmem:[#allocation7 + $0x80] sm:$0xff]   ;;  %v910_v41 = vld [vmem:[#allocation7 + $0x8] sm:$0xff]   ;;  %v915_v46 = vld [vmem:[#allocation7 + $0x90] sm:$0xff]   ;;  %v111_v9 = vsub.s32 3, %v98_v4 }
  0x46   :  { %284 = vmatpush1.bf16.msra.mxu0 %v878_v15  ;;  %325 = vmatpush1.bf16.msra.mxu1 %v879_v16  ;;  %v911_v42 = vld [vmem:[#allocation7 + $0x88] sm:$0xff]   ;;  %v916_v47 = vld [vmem:[#allocation7 + $0x58] sm:$0xff]   ;;  %v920_v51 = vld [vmem:[#allocation7 + $0x60] sm:$0xff]  }
  0x47   :  { %285 = vmatprep.subr.bf16.mxu0 %v880_v17  ;;  %326 = vmatprep.subr.bf16.mxu1 %v882_v18  ;;  %v917_v48 = vld [vmem:[#allocation7 + $0xd8] sm:$0xff]   ;;  %v921_v52 = vld [vmem:[#allocation7 + $0xe0] sm:$0xff]   ;;  %v924_v55 = vld [vmem:[#allocation7 + $0x68] sm:$0xff]  }
  0x48   :  { %v918_v49 = vld [vmem:[#allocation7 + $0x18] sm:$0xff]   ;;  %v922_v53 = vld [vmem:[#allocation7 + $0x20] sm:$0xff]   ;;  %v925_v56 = vld [vmem:[#allocation7 + $0xe8] sm:$0xff]  }
  0x49   :  { %v919_v50 = vld [vmem:[#allocation7 + $0x98] sm:$0xff]   ;;  %v923_v54 = vld [vmem:[#allocation7 + $0xa0] sm:$0xff]   ;;  %v926_v57 = vld [vmem:[#allocation7 + $0x28] sm:$0xff]  }
  0x4a   :  { %286 = vmatpush1.bf16.msra.mxu0 %v884_v19  ;;  %327 = vmatpush1.bf16.msra.mxu1 %v885_v20  ;;  %v927_v58 = vld [vmem:[#allocation7 + $0xa8] sm:$0xff]   ;;  %v928_v59 = vld [vmem:[#allocation7 + $0x70] sm:$0xff]   ;;  %v932_v63 = vld [vmem:[#allocation7 + $0x78] sm:$0xff]  }
  0x4b   :  { %287 = vmatprep.subr.bf16.mxu0 %v886_v21  ;;  %328 = vmatprep.subr.bf16.mxu1 %v888_v22  ;;  %v929_v60 = vld [vmem:[#allocation7 + $0xf0] sm:$0xff]   ;;  %v933_v0 = vld [vmem:[#allocation7 + $0xf8] sm:$0xff]  }
  0x4c   :  { %v930_v61 = vld [vmem:[#allocation7 + $0x30] sm:$0xff]   ;;  %v934_v1 = vld [vmem:[#allocation7 + $0x38] sm:$0xff]  }
  0x4d   :  { %v931_v62 = vld [vmem:[#allocation7 + $0xb0] sm:$0xff]   ;;  %v935_v2 = vld [vmem:[#allocation7 + $0xb8] sm:$0xff]  }
  0x4e   :  { %288 = vmatpush1.bf16.msra.mxu0 %v890_v23  ;;  %329 = vmatpush1.bf16.msra.mxu1 %v891_v24  ;;  %v95_v7 = vld [vmem:[%s1129_s2] sm:$0xf] }
  0x4f   :  { %289 = vmatprep.subr.bf16.mxu0 %v892_v25  ;;  %330 = vmatprep.subr.bf16.mxu1 %v894_v26  ;;  %v100_v10 = vrot.slane %v95_v7, %v99_v5  ;;  %v108_v11 = vrot.slane %v95_v7, %v107_v6  ;;  %v104_v12 = vrot.slane %v95_v7, %v103_v8 }
  0x50   :  { %v112_v13 = vrot.slane %v95_v7, %v111_v9 }
  0x52   :  { %290 = vmatpush1.bf16.msra.mxu0 %v896_v27  ;;  %331 = vmatpush1.bf16.msra.mxu1 %v897_v28 }
  0x53   :  { %291 = vmatprep.subr.bf16.mxu0 %v898_v29  ;;  %332 = vmatprep.subr.bf16.mxu1 %v900_v30 }
  0x56   :  { %292 = vmatpush1.bf16.msra.mxu0 %v902_v31  ;;  %333 = vmatpush1.bf16.msra.mxu1 %v903_v32 }
  0x57   :  { %803 = vmatprep.subr.bf16.mxu0 %v904_v34  ;;  %825 = vmatprep.subr.bf16.mxu1 %v905_v35 }
  0x59   :  { %310 = vmatmul.mubr.bf16.vlgmr.msra.gmra.mrb[0].mxu0 %v62_v37  ;;  %351 = vmatmul.mubr.bf16.vlgmr.msra.gmra.mrb[0].mxu1 %v62_v37 }
  0x5a   :  { %804 = vmatpush3.bf16.msra.mxu0 %v906_v36  ;;  %826 = vmatpush3.bf16.msra.mxu1 %v907_v38  ;;  %v770_v36 = vld [vmem:[%s1131_s4] ss:$0 sm:$0xff]  ;;  %s1042_s4 = smov [#allocation8]  }
  0x5b   :  { %805 = vmatprep.subr.bf16.mxu0 %v908_v39  ;;  %827 = vmatprep.subr.bf16.mxu1 %v909_v40  ;;  %s728_s8 = sshll.u32 %s1042_s4, 4  ;;  %s729_s8 = int_to_ptr.vmem [resolvable:$true] %s728_s8 }
  0x5c   :  { %s1006_s9 = scalar_lea.vmem %s729_s8, 128  ;;  %p1011_p11 = scmp.lt.s32.totalorder %s729_s8, %s729_s8 }
  0x5d   :  { %p1007_p10 = scmp.ne.s32.totalorder %s729_s8, %s1006_s9  ;;  %p1012_p12 = scmp.lt.s32.totalorder %s1006_s9, %s1006_s9 }
  0x5e   :  { %806 = vmatpush3.bf16.msra.mxu0 %v910_v41  ;;  %828 = vmatpush3.bf16.msra.mxu1 %v911_v42 }
  0x5f   :  { %807 = vmatprep.subr.bf16.mxu0 %v912_v43  ;;  %829 = vmatprep.subr.bf16.mxu1 %v913_v44  ;;  %p1013_p13 = por %p1012_p12, %p1011_p11 }
  0x61   :  { %p1014_p0 = pnand %p1013_p13, %p1007_p10 }
  0x62   :  { %808 = vmatpush3.bf16.msra.mxu0 %v914_v45  ;;  %830 = vmatpush3.bf16.msra.mxu1 %v915_v46 }
  0x63   :  { %809 = vmatprep.subr.bf16.mxu0 %v916_v47  ;;  %831 = vmatprep.subr.bf16.mxu1 %v917_v48 }
  0x66   :  { %810 = vmatpush3.bf16.msra.mxu0 %v918_v49  ;;  %832 = vmatpush3.bf16.msra.mxu1 %v919_v50 }
  0x67   :  { %811 = vmatprep.subr.bf16.mxu0 %v920_v51  ;;  %833 = vmatprep.subr.bf16.mxu1 %v921_v52 }
  0x6a   :  { %812 = vmatpush3.bf16.msra.mxu0 %v922_v53  ;;  %834 = vmatpush3.bf16.msra.mxu1 %v923_v54 }
  0x6b   :  { %813 = vmatprep.subr.bf16.mxu0 %v924_v55  ;;  %835 = vmatprep.subr.bf16.mxu1 %v925_v56 }
  0x6e   :  { %814 = vmatpush3.bf16.msra.mxu0 %v926_v57  ;;  %836 = vmatpush3.bf16.msra.mxu1 %v927_v58 }
  0x6f   :  { %815 = vmatprep.subr.bf16.mxu0 %v928_v59  ;;  %837 = vmatprep.subr.bf16.mxu1 %v929_v60 }
  0x72   :  { %816 = vmatpush3.bf16.msra.mxu0 %v930_v61  ;;  %838 = vmatpush3.bf16.msra.mxu1 %v931_v62 }
  0x73   :  { %817 = vmatprep.subr.bf16.mxu0 %v932_v63  ;;  %839 = vmatprep.subr.bf16.mxu1 %v933_v0 }
  0x76   :  { %818 = vmatpush3.bf16.msra.mxu0 %v934_v1  ;;  %840 = vmatpush3.bf16.msra.mxu1 %v935_v2 }
 0x12c   :  { %v311_v14 = vpop.f32.mrb[0].mxu0  ;;  %v352_v15 = vpop.f32.mrb[0].mxu1 }
 0x12d   :  { %v312_v16 = vadd.f32 %v311_v14, %v100_v10  ;;  %v353_v17 = vadd.f32 %v352_v15, %v108_v11  ;;  %v313_v18 = vpop.f32.mrb[1].mxu0  ;;  %v354_v19 = vpop.f32.mrb[1].mxu1 }
 0x12e   :  { %v314_v20 = vadd.f32 %v313_v18, %v104_v12  ;;  %v355_v21 = vadd.f32 %v354_v19, %v112_v13  ;;  %v315_v22 = vpop.f32.mrb[2].mxu0  ;;  %v356_v23 = vpop.f32.mrb[2].mxu1 }
 0x12f   :  { %v359_v24 = vmax.f32 %v312_v16, 0.0  ;;  %v361_v25 = vmax.f32 %v353_v17, 0.0  ;;  %v316_v26 = vpop.f32.mrb[3].mxu0  ;;  %v357_v27 = vpop.f32.mrb[3].mxu1 }
 0x130   :  { %v360_v28 = vmax.f32 %v314_v20, 0.0  ;;  %v362_v29 = vmax.f32 %v355_v21, 0.0 }
 0x131   :  { %v365_v30 = vpack.c.bf16 %v361_v25, %v361_v25  ;;  %v363_v33 = vpack.c.bf16 %v359_v24, %v359_v24 }
 0x132   :  { %v364_v31 = vpack.c.bf16 %v360_v28, %v360_v28  ;;  %v366_v32 = vpack.c.bf16 %v362_v29, %v362_v29 }
 0x134   :  { %662 = vmatprep.mubr.bf16.mxu0 %v364_v31  ;;  %702 = vmatprep.mubr.bf16.mxu1 %v366_v32 }
 0x135   :  { %663 = vmatmul.mubr.bf16.vlgmr.msra.gmra.mrb[4].mxu0 %v363_v33  ;;  %703 = vmatmul.mubr.bf16.vlgmr.msra.gmra.mrb[4].mxu1 %v365_v30 }
 0x208   :  { %v819_v34 = vpop.f32.mrb[4].mxu0  ;;  %v841_v35 = vpop.f32.mrb[4].mxu1 }
 0x209   :  { %v820_v37 = vpop.f32.mrb[5].mxu0  ;;  %v842_v38 = vpop.f32.mrb[5].mxu1 }
 0x20a   :  { %v821_v39 = vadd.f32 %v820_v37, %v819_v34  ;;  %v843_v40 = vadd.f32 %v842_v38, %v841_v35  ;;  %v822_v41 = vpop.f32.mrb[6].mxu0  ;;  %v844_v42 = vpop.f32.mrb[6].mxu1 }
 0x20b   :  { %v823_v43 = vpop.f32.mrb[7].mxu0  ;;  %v845_v44 = vpop.f32.mrb[7].mxu1 }
 0x20c   :  { %v665_v45 = vadd.f32 %v821_v39, %v770_v36 }
 0x20e   :  { %v705_v46 = vadd.f32 %v843_v40, %v665_v45 }
 0x210   :  { %710 = vmax.xlane.f32.xlu0 %v705_v46 }
 0x29d   :  { %v711_v47 = vpop.xlane.xlu0 %710 }
 0x29e   :  { %v712_v48 = vsub.f32 %v705_v46, %v711_v47 }
 0x2a0   :  { %v713_v49 = vmul.f32 1.442695, %v712_v48 }
 0x2a2   :  { %936 = vpow2.f32 %v713_v49 }
 0x2ac   :  { %v937_v50 = vpop.eup %936 }
 0x2ad   :  { %715 = vadd.xlane.f32.xlu0 %v937_v50 }
 0x33a   :  { %v716_v51 = vpop.xlane.xlu0 %715 }
 0x33b   :  { %938 = vlog2.f32 %v716_v51 }
 0x345   :  { %v939_v52 = vpop.eup %938 }
 0x346   :  { %v718_v53 = vmul.f32 0.6931472, %v939_v52 }
 0x348   :  { %v719_v54 = vadd.f32 %v718_v53, %v711_v47 }
 0x34a   :  { %v720_v55 = vsub.f32 %v705_v46, %v719_v54 }
 0x34c   :  { %721 = vst [vmem:[#allocation8] sm:$0xff] %v720_v55 }
 0x34d   :  { %1017 = shalt.err (!%p1014_p0)
}
 0x34e   :  { %s1018_s12 = scalar_lea.hbm %s1132_s5, 128 }
 0x34f   :  { %p1019_p1 = scmp.ne.s32.totalorder %s1132_s5, %s1018_s12  ;;  %p1022_p2 = scmp.lt.u32.totalorder %s1018_s12, %s1132_s5 }
 0x351   :  { %p1024_p3 = pnand %p1022_p2, %p1019_p1 }
 0x353   :  { %1027 = shalt.err (!%p1024_p3)
}
 0x354   :  { %731 = dma.vmem_to_hbm [thread:$0]  %s729_s8, 128, %s1132_s5, [#allocation4]  }
 0x355   :  { %1032 = dma.done.wait [#allocation4], 128  }
 0x356   :  { %1033 = vsyncadd [#allocation4], 4294967168 }
 0x357   :  { %735 = vsyncpa [#allocation3], 1 }
 0x358   :  { %736 = vsyncpa [#allocation6], 1 }
 0x359   :  { %737 = vsyncpa [#allocation4], 1 }

</bundles_post_ra>
